<compile_context>
chip_gen: v5e
topology: v5e:2x2
jax: 0.10.0
libtpu: 0.0.40
codegen_flags: <defaults>
</compile_context>

<pallas_src>
import jax
import jax.numpy as jnp
from jax.experimental import pallas as pl
from jax.experimental.pallas import tpu as pltpu


def _round_up(x, m):
    return ((x + m - 1) // m) * m


def _vmem_budget_bytes():
    """Generation-aware scoped-VMEM budget (~3/4 of physical VMEM, <= 96 MiB)."""
    physical = 128 * 1024 * 1024
    try:
        physical = int(getattr(pltpu.get_tpu_info(), "vmem_capacity_bytes", physical))
    except Exception:  # non-TPU backend / older jax: fall back to 128 MiB assumption
        pass
    # v5e/v6e: 128 MiB physical -> 96 MiB budget; v7x: 64 MiB -> 48 MiB.
    return int(min(96 * 1024 * 1024, (physical * 3) // 4))


def _pick_batch_tile(batch, hidden, num_classes, in_itemsize, budget):
    """Largest dtype-aligned batch tile whose double-buffered footprint fits
    `budget`, guaranteeing >= 2 grid steps so v7x's two TCs both get work."""
    align = 8 if in_itemsize >= 4 else (16 if in_itemsize == 2 else 32)
    lanes_h = _round_up(hidden, 128)
    lanes_c = _round_up(num_classes, 128)
    headroom = 2 * 1024 * 1024                       # Mosaic internal scratch
    # Resident W / b are still double-buffer allocated by BlockSpec -> count 2x.
    # TODO(synk): pipeline_mode=pl.Buffered(1) on the W/b specs (and a class-axis
    # grid dim) would be needed for very wide classifiers approaching VMEM size.
    fixed = 2 * (_round_up(hidden, 8) * lanes_c * in_itemsize + 8 * lanes_c * 4)
    # Double-buffered input tile rows + double-buffered f32 output tile rows.
    per_row = 2 * (lanes_h * in_itemsize + lanes_c * 4)
    tb = (budget - headroom - fixed) // max(per_row, 1)
    tb = max(align, min(2048, int(tb)))
    # >= 2 grid steps so the "parallel" batch axis can shard across v7x's two
    # TensorCores (harmless on single-TC v5e/v6e).
    two_step = _round_up(-(-batch // 2), align)
    tb = min(tb, two_step)
    tb = (tb // 256) * 256 if tb >= 256 else (tb // align) * align
    tb = max(tb, align)
    return batch if tb >= batch else tb


def _compiler_params(budget):
    return pltpu.CompilerParams(
        dimension_semantics=("parallel",),
        vmem_limit_bytes=int(budget),
    )


# ---------------------------------------------------------------------------
# Kernel 1: fused linear classifier + row softmax -> probabilities (B, C)
# ---------------------------------------------------------------------------
def _classifier_softmax_kernel(f_ref, w_ref, b_ref, p_ref):
    logits = jnp.dot(f_ref[...], w_ref[...], preferred_element_type=jnp.float32)
    logits = logits + b_ref[...].astype(jnp.float32)
    m = jnp.max(logits, axis=1, keepdims=True)
    e = jnp.exp(logits - m)
    p_ref[...] = e / jnp.sum(e, axis=1, keepdims=True)


def classifier_softmax(f, w, b):
    """Pallas fused linear + softmax. f: (B, H), w: (H, C), b: (1, C) -> (B, C) f32."""
    B, H = f.shape
    C = w.shape[1]
    budget = _vmem_budget_bytes()
    TB = _pick_batch_tile(B, H, C, f.dtype.itemsize, budget)
    n_tiles = pl.cdiv(B, TB)
    cost = pl.CostEstimate(
        flops=2 * B * H * C,
        transcendentals=B * C,
        bytes_accessed=(B * H * f.dtype.itemsize + H * C * w.dtype.itemsize
                        + C * 4 + B * C * 4),
    )
    return pl.pallas_call(
        _classifier_softmax_kernel,
        out_shape=jax.ShapeDtypeStruct((B, C), jnp.float32),
        grid=(n_tiles,),
        in_specs=[
            pl.BlockSpec((TB, H), lambda i: (i, 0)),   # streamed feature tiles
            pl.BlockSpec((H, C), lambda i: (0, 0)),    # resident classifier weight
            pl.BlockSpec((1, C), lambda i: (0, 0)),    # resident classifier bias
        ],
        out_specs=pl.BlockSpec((TB, C), lambda i: (i, 0)),
        compiler_params=_compiler_params(budget),
        cost_estimate=cost,
    )(f, w, b)


# ---------------------------------------------------------------------------
# Kernel 2: fused linear + softmax + per-half Gram accumulation (no (B,C) HBM
# writeback); outputs tiny per-tile (C, C) partials summed in the wrapper.
# ---------------------------------------------------------------------------
def _make_gram_kernel(tile_b, half, total):
    def kernel(f_ref, w_ref, b_ref, gs_ref, gt_ref):
        logits = jnp.dot(f_ref[...], w_ref[...], preferred_element_type=jnp.float32)
        logits = logits + b_ref[...].astype(jnp.float32)
        m = jnp.max(logits, axis=1, keepdims=True)
        e = jnp.exp(logits - m)
        p = e / jnp.sum(e, axis=1, keepdims=True)
        # Global row ids for this tile.  Padded / out-of-range rows can hold
        # garbage (even NaN) after the softmax, so SELECT them to zero (a
        # multiply would propagate NaN) before accumulating the Grams.
        row = (pl.program_id(0) * tile_b
               + jax.lax.broadcasted_iota(jnp.int32, (tile_b, 1), 0))
        p_s = jnp.where(row < half, p, 0.0)
        p_t = jnp.where(jnp.logical_and(row >= half, row < total), p, 0.0)
        dims = (((0,), (0,)), ((), ()))            # contract over rows: P^T @ P
        gs_ref[0] = jax.lax.dot_general(p_s, p_s, dims,
                                        preferred_element_type=jnp.float32)
        gt_ref[0] = jax.lax.dot_general(p_t, p_t, dims,
                                        preferred_element_type=jnp.float32)
    return kernel


def classifier_softmax_gram(f, w, b):
    """Returns (G_s, G_t), each (C, C) f32 with G = P^T P over that half's rows."""
    B, H = f.shape
    C = w.shape[1]
    half = B // 2
    budget = _vmem_budget_bytes()
    TB = _pick_batch_tile(B, H, C, f.dtype.itemsize, budget)
    n_tiles = pl.cdiv(B, TB)
    kernel = _make_gram_kernel(TB, half, B)
    cost = pl.CostEstimate(
        flops=2 * B * H * C + 4 * B * C * C,
        transcendentals=B * C,
        bytes_accessed=(B * H * f.dtype.itemsize + H * C * w.dtype.itemsize
                        + C * 4 + 2 * n_tiles * C * C * 4),
    )
    gs, gt = pl.pallas_call(
        kernel,
        out_shape=(jax.ShapeDtypeStruct((n_tiles, C, C), jnp.float32),
                   jax.ShapeDtypeStruct((n_tiles, C, C), jnp.float32)),
        grid=(n_tiles,),
        in_specs=[
            pl.BlockSpec((TB, H), lambda i: (i, 0)),   # streamed feature tiles
            pl.BlockSpec((H, C), lambda i: (0, 0)),    # resident classifier weight
            pl.BlockSpec((1, C), lambda i: (0, 0)),    # resident classifier bias
        ],
        out_specs=(pl.BlockSpec((1, C, C), lambda i: (i, 0, 0)),
                   pl.BlockSpec((1, C, C), lambda i: (i, 0, 0))),
        compiler_params=_compiler_params(budget),
        cost_estimate=cost,
    )(f, w, b)
    return gs.sum(axis=0), gt.sum(axis=0)


# ---------------------------------------------------------------------------
# Loss wrapper
# ---------------------------------------------------------------------------
def _nuclear_norm_from_gram(g):
    ev = jnp.linalg.eigvalsh(g)
    return jnp.sum(jnp.sqrt(jnp.maximum(ev, 0.0)))


def nuclear_wasserstein_discrepancy(f, w, b, coeff=1.0, use_gram=True):
    """Forward pass of NuclearWassersteinDiscrepancy with a linear classifier."""
    B = f.shape[0]
    assert B % 2 == 0, "batch must be even (y.chunk(2, dim=0))"
    half = B // 2
    # TODO(synk): WarmStartGradientReverseLayer is identity in the forward pass;
    # its gradient-reversal / warm-start schedule would need a custom VJP.
    if use_gram:
        # ||P||_nuc = sum(sqrt(eig(P^T P))) on CxC Gram matrices accumulated
        # in-kernel (no (B, C) HBM writeback, no tall SVD).  Squaring doubles
        # the condition number -> keep use_gram=False for strict validation.
        g_s, g_t = classifier_softmax_gram(f, w, b)
        nuc_s = _nuclear_norm_from_gram(g_s)
        nuc_t = _nuclear_norm_from_gram(g_t)
    else:
        # TODO(synk): the nuclear norm needs an SVD, which has no Pallas
        # primitive; computed with jnp.linalg.svd on the (B/2, C) prob matrices.
        probs = classifier_softmax(f, w, b)
        nuc_s = jnp.sum(jnp.linalg.svd(probs[:half], compute_uv=False))
        nuc_t = jnp.sum(jnp.linalg.svd(probs[half:], compute_uv=False))
    loss = coeff * (-nuc_t + nuc_s) / half
    return -1.0 * loss


def nuclear_wasserstein_discrepancy_ref(f, w, b, coeff=1.0):
    """Pure-JAX reference matching the PyTorch forward."""
    B = f.shape[0]
    y = f.astype(jnp.float32) @ w.astype(jnp.float32) + b.astype(jnp.float32)
    p = jax.nn.softmax(y, axis=1)
    pre_s, pre_t = p[: B // 2], p[B // 2:]
    nuc_s = jnp.sum(jnp.linalg.svd(pre_s, compute_uv=False))
    nuc_t = jnp.sum(jnp.linalg.svd(pre_t, compute_uv=False))
    loss = coeff * (-nuc_t + nuc_s) / (B // 2)
    return -1.0 * loss


if __name__ == "__main__":
    key = jax.random.PRNGKey(0)
    kf, kw, kb, kf2 = jax.random.split(key, 4)
    # Small shapes: batch=16 (8 source + 8 target rows), hidden=32, classes=8.
    B, H, C = 16, 32, 8
    f = jax.random.normal(kf, (B, H), dtype=jnp.float32)
    w = 0.1 * jax.random.normal(kw, (H, C), dtype=jnp.float32)   # classifier weight
    b = 0.01 * jax.random.normal(kb, (1, C), dtype=jnp.float32)  # classifier bias
    coeff = 1.0

    ref = jax.block_until_ready(
        nuclear_wasserstein_discrepancy_ref(f, w, b, coeff=coeff))

    # Fast path: in-kernel Gram accumulation + CxC eigh (squared conditioning
    # -> looser tolerance).
    out_gram = jax.block_until_ready(
        nuclear_wasserstein_discrepancy(f, w, b, coeff=coeff, use_gram=True))
    assert jnp.allclose(out_gram, ref, rtol=1e-3, atol=1e-4), (out_gram, ref)

    # Exact-SVD fallback path: strict tolerance.
    out_svd = jax.block_until_ready(
        nuclear_wasserstein_discrepancy(f, w, b, coeff=coeff, use_gram=False))
    assert jnp.allclose(out_svd, ref, rtol=1e-4, atol=1e-5), (out_svd, ref)

    # Check the Pallas fused linear+softmax output directly.
    probs = jax.block_until_ready(classifier_softmax(f, w, b))
    probs_ref = jax.nn.softmax(f @ w + b, axis=1)
    assert jnp.allclose(probs, probs_ref, rtol=1e-5, atol=1e-6)

    # Partial-last-tile + split-inside-a-tile coverage for the Gram kernel
    # (B=20 -> TB=16: tile 0 mixes source/target rows, tile 1 has padded rows).
    B2 = 20
    f2 = jax.random.normal(kf2, (B2, H), dtype=jnp.float32)
    out2 = jax.block_until_ready(
        nuclear_wasserstein_discrepancy(f2, w, b, coeff=coeff, use_gram=True))
    ref2 = jax.block_until_ready(
        nuclear_wasserstein_discrepancy_ref(f2, w, b, coeff=coeff))
    assert jnp.allclose(out2, ref2, rtol=1e-3, atol=1e-4), (out2, ref2)

    print("KERNEL_OK")
</pallas_src>

<mosaic_0001>
module attributes {stable_mosaic.version = 11 : i64} {
  func.func @kernel(%arg0: i32, %arg1: memref<8x32xf32, #tpu.memory_space<vmem>>, %arg2: memref<32x8xf32, #tpu.memory_space<vmem>>, %arg3: memref<1x8xf32, #tpu.memory_space<vmem>>, %arg4: memref<1x8x8xf32, #tpu.memory_space<vmem>>, %arg5: memref<1x8x8xf32, #tpu.memory_space<vmem>>) attributes {dimension_semantics = [#tpu.dimension_semantics<parallel>], iteration_bounds = array<i64: 2>, scalar_prefetch = 0 : i64, scratch_operands = 0 : i64, tpu.core_type = #tpu.core_type<tc>, window_params = [{transform_indices = @transform_0, window_bounds = array<i64: 8, 32>}, {pipeline_mode = #tpu.pipeline_mode<synchronous>, transform_indices = @transform_1, window_bounds = array<i64: 32, 8>}, {pipeline_mode = #tpu.pipeline_mode<synchronous>, transform_indices = @transform_2, window_bounds = array<i64: 1, 8>}, {transform_indices = @transform_3, window_bounds = array<i64: 1, 8, 8>}, {transform_indices = @transform_4, window_bounds = array<i64: 1, 8, 8>}]} {
    %c0 = arith.constant 0 : index
    %c0_0 = arith.constant 0 : index
    %0 = vector.load %arg1[%c0, %c0_0] : memref<8x32xf32, #tpu.memory_space<vmem>>, vector<8x32xf32>
    %c0_1 = arith.constant 0 : index
    %c0_2 = arith.constant 0 : index
    %1 = vector.load %arg2[%c0_1, %c0_2] : memref<32x8xf32, #tpu.memory_space<vmem>>, vector<32x8xf32>
    %cst = arith.constant dense<0.000000e+00> : vector<8x8xf32>
    %2 = tpu.matmul %0, %1, %cst {dimension_numbers = #tpu.dot_dimension_numbers<[1], [0], [0], [1], [0, 0, 1, 1], [], []>} : vector<8x32xf32>, vector<32x8xf32>, vector<8x8xf32> -> vector<8x8xf32>
    %c0_3 = arith.constant 0 : index
    %c0_4 = arith.constant 0 : index
    %3 = vector.load %arg3[%c0_3, %c0_4] : memref<1x8xf32, #tpu.memory_space<vmem>>, vector<1x8xf32>
    %4 = vector.broadcast %3 : vector<1x8xf32> to vector<8x8xf32>
    %5 = arith.addf %2, %4 : vector<8x8xf32>
    %cst_5 = arith.constant dense<0xFF800000> : vector<8xf32>
    %6 = vector.multi_reduction <maximumf>, %5, %cst_5 [1] : vector<8x8xf32> to vector<8xf32>
    %7 = vector.shape_cast %6 : vector<8xf32> to vector<8x1xf32>
    %8 = vector.broadcast %7 : vector<8x1xf32> to vector<8x8xf32>
    %9 = arith.subf %5, %8 : vector<8x8xf32>
    %10 = math.exp %9 : vector<8x8xf32>
    %cst_6 = arith.constant dense<0.000000e+00> : vector<8xf32>
    %11 = vector.multi_reduction <add>, %10, %cst_6 [1] : vector<8x8xf32> to vector<8xf32>
    %12 = vector.shape_cast %11 : vector<8xf32> to vector<8x1xf32>
    %13 = vector.broadcast %12 : vector<8x1xf32> to vector<8x8xf32>
    %14 = arith.divf %10, %13 : vector<8x8xf32>
    %c8_i32 = arith.constant 8 : i32
    %15 = arith.muli %arg0, %c8_i32 : i32
    %16 = tpu.iota {dimensions = array<i32: 0>} : vector<8x1xi32>
    %17 = vector.broadcast %15 : i32 to vector<8x1xi32>
    %18 = arith.addi %17, %16 : vector<8x1xi32>
    %c8_i32_7 = arith.constant 8 : i32
    %19 = vector.broadcast %c8_i32_7 : i32 to vector<8x1xi32>
    %20 = arith.cmpi slt, %18, %19 : vector<8x1xi32>
    %cst_8 = arith.constant 0.000000e+00 : f32
    %21 = vector.shape_cast %20 : vector<8x1xi1> to vector<8x1xi1>
    %22 = vector.broadcast %21 : vector<8x1xi1> to vector<8x8xi1>
    %23 = vector.broadcast %cst_8 : f32 to vector<8x8xf32>
    %24 = arith.select %22, %14, %23 : vector<8x8xi1>, vector<8x8xf32>
    %c8_i32_9 = arith.constant 8 : i32
    %25 = vector.broadcast %c8_i32_9 : i32 to vector<8x1xi32>
    %26 = arith.cmpi sge, %18, %25 : vector<8x1xi32>
    %c16_i32 = arith.constant 16 : i32
    %27 = vector.broadcast %c16_i32 : i32 to vector<8x1xi32>
    %28 = arith.cmpi slt, %18, %27 : vector<8x1xi32>
    %29 = arith.andi %26, %28 : vector<8x1xi1>
    %cst_10 = arith.constant 0.000000e+00 : f32
    %30 = vector.shape_cast %29 : vector<8x1xi1> to vector<8x1xi1>
    %31 = vector.broadcast %30 : vector<8x1xi1> to vector<8x8xi1>
    %32 = vector.broadcast %cst_10 : f32 to vector<8x8xf32>
    %33 = arith.select %31, %14, %32 : vector<8x8xi1>, vector<8x8xf32>
    %cst_11 = arith.constant dense<0.000000e+00> : vector<8x8xf32>
    %34 = tpu.matmul %24, %24, %cst_11 {dimension_numbers = #tpu.dot_dimension_numbers<[0], [0], [1], [1], [0, 1, 1, 1], [], []>} : vector<8x8xf32>, vector<8x8xf32>, vector<8x8xf32> -> vector<8x8xf32>
    %c0_12 = arith.constant 0 : index
    %c0_13 = arith.constant 0 : index
    %c0_14 = arith.constant 0 : index
    %35 = vector.load %arg4[%c0_12, %c0_13, %c0_14] : memref<1x8x8xf32, #tpu.memory_space<vmem>>, vector<1x8x8xf32>
    %36 = vector.shape_cast %35 : vector<1x8x8xf32> to vector<8x8xf32>
    %37 = vector.shape_cast %34 : vector<8x8xf32> to vector<1x8x8xf32>
    tpu.vector_store %arg4[%c0_12, %c0_13, %c0_14], %37 {strides = array<i32>} : memref<1x8x8xf32, #tpu.memory_space<vmem>>, vector<1x8x8xf32>,
    %cst_15 = arith.constant dense<0.000000e+00> : vector<8x8xf32>
    %38 = tpu.matmul %33, %33, %cst_15 {dimension_numbers = #tpu.dot_dimension_numbers<[0], [0], [1], [1], [0, 1, 1, 1], [], []>} : vector<8x8xf32>, vector<8x8xf32>, vector<8x8xf32> -> vector<8x8xf32>
    %c0_16 = arith.constant 0 : index
    %c0_17 = arith.constant 0 : index
    %c0_18 = arith.constant 0 : index
    %39 = vector.load %arg5[%c0_16, %c0_17, %c0_18] : memref<1x8x8xf32, #tpu.memory_space<vmem>>, vector<1x8x8xf32>
    %40 = vector.shape_cast %39 : vector<1x8x8xf32> to vector<8x8xf32>
    %41 = vector.shape_cast %38 : vector<8x8xf32> to vector<1x8x8xf32>
    tpu.vector_store %arg5[%c0_16, %c0_17, %c0_18], %41 {strides = array<i32>} : memref<1x8x8xf32, #tpu.memory_space<vmem>>, vector<1x8x8xf32>,
    return
  }
  func.func @transform_0(%arg0: i32) -> (i32, i32) {
    %c0_i32 = arith.constant 0 : i32
    %c0_i32_0 = arith.constant 0 : i32
    return %arg0, %c0_i32 : i32, i32
  }
  func.func @transform_1(%arg0: i32) -> (i32, i32) {
    %c0_i32 = arith.constant 0 : i32
    %c0_i32_0 = arith.constant 0 : i32
    %c0_i32_1 = arith.constant 0 : i32
    return %c0_i32, %c0_i32_0 : i32, i32
  }
  func.func @transform_2(%arg0: i32) -> (i32, i32) {
    %c0_i32 = arith.constant 0 : i32
    %c0_i32_0 = arith.constant 0 : i32
    %c0_i32_1 = arith.constant 0 : i32
    return %c0_i32, %c0_i32_0 : i32, i32
  }
  func.func @transform_3(%arg0: i32) -> (i32, i32, i32) {
    %c0_i32 = arith.constant 0 : i32
    %c0_i32_0 = arith.constant 0 : i32
    %c0_i32_1 = arith.constant 0 : i32
    return %arg0, %c0_i32, %c0_i32_0 : i32, i32, i32
  }
  func.func @transform_4(%arg0: i32) -> (i32, i32, i32) {
    %c0_i32 = arith.constant 0 : i32
    %c0_i32_0 = arith.constant 0 : i32
    %c0_i32_1 = arith.constant 0 : i32
    return %arg0, %c0_i32, %c0_i32_0 : i32, i32, i32
  }
}

</mosaic_0001>

<bundles_post_ra>
// kernel: tpu_custom_call.1
= control target key start
LH: loop header
LB: loop body
LE: loop exit
PB: predicated region body
PF: predicated region fallthrough
CT: control target
= control target key end

     0   :  { %10 = vsyncpa [#allocation3], 0  ;;  %s845_s0 = inlined_call_operand.vmem [shape: f32[16,32], index: 0, kind: input, shape index: {}]   ;;  %s846_s1 = inlined_call_operand.vmem [shape: f32[32,8], index: 1, kind: input, shape index: {}]   ;;  %s847_s2 = inlined_call_operand.vmem [shape: f32[1,8], index: 2, kind: input, shape index: {}]   ;;  %s848_s3 = inlined_call_operand.hbm [shape: f32[2,8,8], index: 3, kind: output, shape index: {0}]   ;;  %s849_s4 = inlined_call_operand.hbm [shape: f32[2,8,8], index: 4, kind: output, shape index: {1}]  }
   0x1   :  { %12 = vsyncpa [#allocation3 + $0x1], 0 }
   0x2   :  { %13 = vsyncpa [#allocation5], 0 }
   0x3   :  { %15 = vsyncpa [#allocation5 + $0x1], 0  ;;  %s706_s15 = smov 0   ;;  %s708_s16 = smov 0  }
   0x4   :  { %s710_s17 = smov 0   ;;  %s712_s18 = smov 0  }
   0x5 LB: > { %s727_s19 = sadd.s32 4294967295, %s679_s18   ;;  %s516_s20 = sadd.s32 4294967294, %s679_s18   ;;  %s679_s18 = sphi %s712_s18, %s855_s18   ;;  %s675_s17 = sphi %s710_s17, %s854_s17   ;;  %s671_s16 = sphi %s708_s16, %s853_s16   ;;  %s667_s15 = sphi %s706_s15, %s852_s15  }
   0x6   : > { %s731_s21 = sadd.s32 1, %s679_s18   ;;  %s96_s22 = sadd.s32 1, %s675_s17 }
   0x7   : > { %s93_s23 = ssub.s32 %s679_s18, %s731_s21  ;;  %p106_p0 = scmp.ne.s32.totalorder %s675_s17, %s671_s16 }
   0x8   : > { %p94_p1 = scmp.eq.s32.totalorder %s93_s23, 0  ;;  %p107_p2 = scmp.eq.s32.totalorder %s727_s19, 1 }
   0x9   : > { %p112_p3 = scmp.ne.s32.totalorder %s671_s16, %s667_s15  ;;  %p113_p4 = scmp.eq.s32.totalorder %s516_s20, 1 }
   0xa   : > { %s742_s24 = scalar_select %p94_p1, %s675_s17, %s96_s22  }
   0xb   : > { %p744_p5 = por %p107_p2, %p106_p0  ;;  %p748_p6 = por %p113_p4, %p112_p3 }
   0xc   : > { %p519_p7 = scmp.ge.s32.totalorder %s679_s18, 1  ;;  %p170_p8 = scmp.lt.s32.totalorder %s679_s18, 3 }
   0xe   : > { %p171_p9 = pnand %p519_p7, %p170_p8 }
   0xf   : > { %p200_p10 = scmp.lt.s32.totalorder (!%p171_p9), %s727_s19, 1  ;;  %s777_s22 = sshll.u32 (!%p171_p9), %s727_s19, 3 }
  0x10   : > { %174 = sbr.rel (%p171_p9) target bundleno = 735 (0x2df), region = 32  ;;  %s419_s29 = scalar_lea.hbm (!%p171_p9), %s849_s4, %s777_s22 }
  0x11   : > { %s405_s6 = scalar_lea.hbm (!%p171_p9), %s848_s3, %s777_s22  ;;  %s423_s9 = sshll.u32 (!%p171_p9), %s419_s29, 4  ;;  %s424_s9 = int_to_ptr.hbm [resolvable:$true] %s423_s9 }
  0x12   : > { %s794_s12 = sshll.u32 (!%p171_p9), %s405_s6, 4  ;;  %s599_s14 = sshra.s32 (!%p171_p9), %s424_s9, 4  ;;  %s410_s12 = int_to_ptr.hbm [resolvable:$true] %s794_s12  ;;  %s600_s14 = int_to_ptr.hbm [resolvable:$true] %s599_s14 }
  0x13   : > { %s601_s20 = scalar_lea.hbm (!%p171_p9), %s600_s14, 8  ;;  %s605_s27 = scalar_lea.hbm (!%p171_p9), %s849_s4, 16 }
  0x14   : > { %p602_p11 = scmp.ne.s32.totalorder (!%p171_p9), %s600_s14, %s601_s20  ;;  %p606_p0 = scmp.lt.s32.totalorder (!%p171_p9), %s600_s14, %s849_s4 }
  0x15   : > { %v208_v0 = vld [vmem:[%s846_s1 + $0x18] sm:$0xff]  ;;  %v207_v1 = vld [vmem:[%s846_s1 + $0x10] sm:$0xff]  ;;  %v206_v2 = vld [vmem:[%s846_s1 + $0x8] sm:$0xff]  ;;  %s201_s7 = scalar_select %p200_p10, %s727_s19, 1  ;;  %vm213_vm0 = vcmask 261120   ;;  %vm237_vm1 = vcmask 64512   ;;  %v263_v15 = vlaneseq  ;;  %v265_v18 = vstv %s777_s22 }
  0x16   : > { %229 = vmatpush.msra.mxu0 %v208_v0  ;;  %v205_v3 = vld [vmem:[%s846_s1] sm:$0xff]  ;;  %s783_s19 = sand.u32 1, %s671_s16   ;;  %p603_p12 = pnand %p602_p11, %p744_p5 }
  0x17   : > { %s522_s10 = sshll.u32 %s201_s7, 3  ;;  %v580_v5 = vld [vmem:[%s847_s2] ss:$0 sm:$0xff]  ;;  %v264_v16 = vshrl.u32 %v263_v15, 7  ;;  %s520_s23 = sshll.u32 %s783_s19, 3 }
  0x18   : > { %230 = vmatpush.msra.mxu0 %v207_v1  ;;  %s203_s13 = scalar_lea.vmem %s845_s0, %s522_s10  ;;  %s199_s7 = scalar_lea.vmem [#allocation4], %s520_s23 }
  0x19   : > { %v204_v4 = vld [vmem:[%s203_s13] sm:$0xff]  ;;  %v266_v21 = vadd.s32 %v265_v18, %v264_v16  ;;  %s421_s8 = sshll.u32 %s199_s7, 4  ;;  %s192_s10 = scalar_lea.vmem [#allocation2], %s520_s23  ;;  %s422_s8 = int_to_ptr.vmem [resolvable:$true] %s421_s8 }
  0x1a   : > { %231 = vmatpush.msra.mxu0 %v206_v2  ;;  %s407_s11 = sshll.u32 %s192_s10, 4  ;;  %s395_s13 = scalar_lea.sflag [#allocation5], %s783_s19  ;;  %s797_s11 = int_to_ptr.vmem [resolvable:$true] %s407_s11 }
  0x1b   : > { %vm271_vm4 = vcmp.ge.s32.totalorder %v266_v21, 8  ;;  %vm272_vm5 = vcmp.lt.s32.totalorder %v266_v21, 16  ;;  %vm267_vm8 = vcmp.lt.s32.totalorder %v266_v21, 8  ;;  %p604_p13 = pneg %p603_p12  ;;  %p607_p1 = scmp.lt.s32.totalorder %s605_s27, %s601_s20 }
  0x1c   : > { %232 = vmatpush.msra.mxu0 %v205_v3  ;;  %vm273_vm9 = vmand %vm271_vm4, %vm272_vm5 }
  0x1d   : > { %523 = vmatmul.msk.f32.vlgmr.msra.gmra.mxu0 %vm213_vm0, %v204_v4  ;;  %p608_p2 = por %p607_p1, %p606_p0 }
  0x1f   : > { %p609_p3 = pnand %p608_p2, %p604_p13 }
  0x9a   : > { %v234_v6 = vpop.f32.mrf.mxu0 }
  0x9b   : > { %v235_v7 = vadd.f32 %v580_v5, %v234_v6 }
  0x9d   : > { %v238_v8 = vsel %vm237_vm1, %v235_v7, -inf }
  0x9e   : > { %239 = vmax.xlane.f32.xlu0 %v238_v8 }
 0x111   : > { %v240_v9 = vpop.xlane.xlu0 %239 }
 0x112   : > { %v241_v10 = vsub.f32 %v235_v7, %v240_v9 }
 0x114   : > { %v242_v11 = vmul.f32 1.442695, %v241_v10 }
 0x116   : > { %581 = vpow2.f32 %v242_v11 }
 0x11c   : > { %v582_v12 = vpop.eup %581 }
 0x11d   : > { %v244_v13 = vsel %vm237_vm1, %v582_v12, 0.0 }
 0x11e   : > { %245 = vadd.xlane.f32.xlu0 %v244_v13 }
 0x191   : > { %v246_v14 = vpop.xlane.xlu0 %245 }
 0x192   : > { %583 = vrcp.f32 %v246_v14  ;;  %v258_v22 = vand.u32 2147483648, %v246_v14  ;;  %v256_v24 = vand.u32 2147483647, %v246_v14  ;;  %vm252_vm3 = vweird.f32 %v246_v14 }
 0x194   : > { %v259_v26 = vor.u32 1.1754944e-38, %v258_v22  ;;  %vm257_vm7 = vcmp.eq.f32.partialorder %v256_v24, 8.507059e+37 }
 0x198   : > { %v584_v17 = vpop.eup %583 }
 0x199   : > { %v248_v19 = vmul.f32 %v584_v17, %v246_v14  ;;  %vm253_vm2 = vweird.f32 %v584_v17 }
 0x19a   : > { %vm254_vm6 = vmor %vm252_vm3, %vm253_vm2 }
 0x19b   : > { %v249_v20 = vsub.f32 1.0, %v248_v19 }
 0x19d   : > { %v250_v23 = vmul.f32 %v584_v17, %v249_v20 }
 0x19f   : > { %v251_v25 = vadd.f32 %v584_v17, %v250_v23 }
 0x1a1   : > { %v255_v27 = vsel %vm254_vm6, %v584_v17, %v251_v25 }
 0x1a2   : > { %v260_v28 = vsel %vm257_vm7, %v259_v26, %v255_v27 }
 0x1a3   : > { %v261_v29 = vmul.f32 %v582_v12, %v260_v28 }
 0x1a5   : > { %525 = vmatpush.msk.msra.mxu1 %vm267_vm8, %v261_v29  ;;  %527 = vmatpush.msk.msra.mxu2 %vm273_vm9, %v261_v29  ;;  %v276_v30 = vsel %vm273_vm9, %v261_v29, 0.0  ;;  %v270_v31 = vsel %vm267_vm8, %v261_v29, 0.0 }
 0x1a6   : > { %333 = vxpose.xlu1.b32.start.end [1/1] (short) (narrow) %v276_v30, 8 }
 0x1ae   : > { %277 = vxpose.xlu1.b32.start.end [1/1] (short) (narrow) %v270_v31, 8 }
 0x24a   : > { %v349_v32 = vpop.trf.xlu1 }
 0x24b   : > { %528 = vmatmul.msk.f32.vlgmr.msra.gmra.mxu2 %vm237_vm1, %v349_v32 }
 0x252   : > { %v293_v33 = vpop.trf.xlu1 }
 0x253   : > { %526 = vmatmul.msk.f32.vlgmr.msra.gmra.mxu1 %vm237_vm1, %v293_v33 }
 0x2ce   : > { %v385_v34 = vpop.f32.mrf.mxu2 }
 0x2cf   : > { %388 = vst.msk [vmem:[%s199_s7] sm:$0xff] %vm237_vm1, %v385_v34 }
 0x2d0   : > { %v329_v35 = vpop.f32.mrf.mxu1 }
 0x2d1   : > { %612 = shalt.err (!%p609_p3)
}
 0x2d2   : > { %536 = dma.vmem_to_hbm [thread:$0]  (%p744_p5), %s422_s8, 128, %s424_s9, %s395_s13   ;;  %332 = vst.msk [vmem:[%s192_s10] sm:$0xff] %vm237_vm1, %v329_v35 }
 0x2d3   : > { %s390_s30 = scalar_lea.sflag [#allocation3], %s783_s19  ;;  %s627_s5 = sshra.s32 %s410_s12, 4  ;;  %s628_s5 = int_to_ptr.hbm [resolvable:$true] %s627_s5 }
 0x2d4   : > { %s629_s6 = scalar_lea.hbm %s628_s5, 8  ;;  %s633_s20 = scalar_lea.hbm %s848_s3, 16 }
 0x2d5   : > { %p630_p4 = scmp.ne.s32.totalorder %s628_s5, %s629_s6  ;;  %p634_p9 = scmp.lt.s32.totalorder %s628_s5, %s848_s3 }
 0x2d6   : > { %p635_p10 = scmp.lt.s32.totalorder %s633_s20, %s629_s6 }
 0x2d7   : > { %p631_p7 = pnand %p630_p4, %p744_p5 }
 0x2d8   : > { %p636_p11 = por %p635_p10, %p634_p9 }
 0x2d9   : > { %p632_p8 = pneg %p631_p7 }
 0x2db   : > { %p637_p12 = pnand %p636_p11, %p632_p8 }
 0x2dd   : > { %640 = shalt.err (!%p637_p12)
}
 0x2de   : > { %535 = dma.vmem_to_hbm [thread:$0]  (%p744_p5), %s797_s11, 128, %s410_s12, %s390_s30  }
 0x2df PF: > { %p546_p13 = scmp.ge.s32.totalorder %s679_s18, 2  ;;  %s435_s19 = sand.u32 1, %s667_s15  }
 0x2e0   : > { %s436_s8 = scalar_lea.sflag [#allocation3], %s435_s19 }
 0x2e1   : > { %p540_p0 = pnand %p546_p13, %p748_p6 }
 0x2e3   : > { %p541_p1 = pneg %p540_p0 }
 0x2e5   : > { %658 = dma.done.wait (%p541_p1), %s436_s8, 128  }
 0x2e6   : > { %660 = vsyncadd (%p541_p1), %s436_s8, 4294967168  ;;  %s446_s9 = scalar_lea.sflag [#allocation5], %s435_s19 }
 0x2e7   : > { %662 = dma.done.wait (%p541_p1), %s446_s9, 128  }
 0x2e8   : > { %664 = vsyncadd (%p541_p1), %s446_s9, 4294967168  ;;  %p18_p5 = scmp.ge.s32.totalorder %s731_s21, 4   ;;  %s852_s15 = smov %s671_s16 }
 0x2e9   : > { %s853_s16 = smov %s675_s17  ;;  %s854_s17 = smov %s742_s24 }
 0x2ea   : > { %s855_s18 = smov %s731_s21  ;;  %20 = sbr.rel (!%p18_p5) target bundleno = 5 (0x5), region = 84 }
 0x2ef   :  { %452 = vsyncpa [#allocation3], 1 }
 0x2f0   :  { %454 = vsyncpa [#allocation3 + $0x1], 1 }
 0x2f1   :  { %455 = vsyncpa [#allocation5], 1 }
 0x2f2   :  { %457 = vsyncpa [#allocation5 + $0x1], 1 }

</bundles_post_ra>
